<compile_context>
chip_gen: v7x
topology: tpu7x:2x2x1
jax: 0.10.0
libtpu: 0.0.40
codegen_flags: <defaults>
</compile_context>

<pallas_src>
import functools

import jax
import jax.numpy as jnp
from jax import lax
from jax.experimental import pallas as pl
from jax.experimental.pallas import tpu as pltpu


def _round_up(a, b):
    return ((a + b - 1) // b) * b


def _cdiv(a, b):
    return (a + b - 1) // b


@functools.lru_cache(maxsize=1)
def _vmem_capacity_bytes():
    """Physical VMEM of the attached TPU (128 MiB v5e/v6e, 64 MiB v7x)."""
    try:
        info = pltpu.get_tpu_info()
        cap = int(getattr(info, "vmem_capacity_bytes", 64 << 20))
        return cap if cap > 0 else (64 << 20)
    except Exception:
        return 64 << 20  # conservative fallback, valid on all generations


def _dot_xwT(x, w):
    # x: (tm, tk), w: (tn, tk) -> (tm, tn); contracts both last dims so W stays
    # in PyTorch (N, K) layout -- no W.T ever materialized in HBM.
    return lax.dot_general(
        x, w,
        dimension_numbers=(((1,), (1,)), ((), ())),
        preferred_element_type=jnp.float32,
    )


# ------------- multi-K-step kernels: accumulate into the resident o_ref -------

def _mm_bias_kernel(x_ref, w_ref, b_ref, o_ref):
    k = pl.program_id(2)

    @pl.when(k == 0)
    def _():
        o_ref[...] = jnp.zeros_like(o_ref)

    o_ref[...] += _dot_xwT(x_ref[...], w_ref[...]).astype(o_ref.dtype)

    @pl.when(k == pl.num_programs(2) - 1)
    def _():
        o_ref[...] = (o_ref[...] + b_ref[...]).astype(o_ref.dtype)


def _mm_nobias_kernel(x_ref, w_ref, o_ref):
    k = pl.program_id(2)

    @pl.when(k == 0)
    def _():
        o_ref[...] = jnp.zeros_like(o_ref)

    o_ref[...] += _dot_xwT(x_ref[...], w_ref[...]).astype(o_ref.dtype)


# ------------- single-K-step fast-path kernels (no accumulation at all) -------

def _mm_bias_single_kernel(x_ref, w_ref, b_ref, o_ref):
    o_ref[...] = (_dot_xwT(x_ref[...], w_ref[...]) + b_ref[...]).astype(o_ref.dtype)


def _mm_nobias_single_kernel(x_ref, w_ref, o_ref):
    o_ref[...] = _dot_xwT(x_ref[...], w_ref[...]).astype(o_ref.dtype)


# ---------------------------------- wrapper -----------------------------------

_TM_MAX = 512    # sublane-dim tile cap (multiple of 8)
_TN_MAX = 1024   # lane-dim tile cap (multiple of 128 -> lane-dense output)
_TK_MAX = 2048   # contraction tile cap when K has to be split


def _balanced_tile(dim, max_tile, align):
    """Whole dim as one block if it fits, else balanced align-multiple tiles."""
    if dim <= max_tile:
        return dim
    nblocks = _cdiv(dim, max_tile)
    return _round_up(_cdiv(dim, nblocks), align)


def _sanitize_tile(t, dim, align):
    """Clamp a tile so the BlockSpec is legal (align-multiple or full dim)."""
    t = min(int(t), dim)
    if t < dim:
        t = _round_up(t, align)
        if t >= dim:
            t = dim
    return max(t, 1)


def _block_bytes(tm, tn, tk, in_bytes, out_bytes):
    # Double-buffered x / W blocks, double-buffered resident output, bias row.
    return (2 * tm * tk * in_bytes + 2 * tn * tk * in_bytes
            + 2 * tm * tn * out_bytes + 2 * tn * 4)


@functools.partial(jax.jit, static_argnames=("tm", "tn", "tk", "compute_dtype"))
def custom_linear(x, W, bias=None, *, tm=None, tn=None, tk=None, compute_dtype=None):
    """Pallas equivalent of CustomLinear.forward: y = x @ W.T (+ bias).

    x:    (M, K) float32
    W:    (N, K) float32   (PyTorch convention: out_size x in_size)
    bias: (N,)   float32 or None
    compute_dtype: optional (e.g. jnp.bfloat16) dtype for the MXU inputs; the
        accumulation stays f32 and the output keeps x.dtype. None = exact f32.
    """
    M, K = x.shape
    N, K2 = W.shape
    assert K == K2, "in_size mismatch"

    out_dtype = x.dtype
    in_dtype = compute_dtype if compute_dtype is not None else x.dtype
    in_bytes = jnp.dtype(in_dtype).itemsize
    out_bytes = jnp.dtype(out_dtype).itemsize

    capacity = _vmem_capacity_bytes()
    budget = int(capacity * 0.75)          # headroom for Mosaic internal scratch
    slack = 2 << 20

    auto_mn = (tm is None) and (tn is None)

    # ---- tile selection (generation-aware via `budget`) ----
    if tm is None:
        tm = _balanced_tile(M, _TM_MAX, 8)
    tm = _sanitize_tile(tm, M, 8)
    if tn is None:
        tn = _balanced_tile(N, _TN_MAX, 128)
    tn = _sanitize_tile(tn, N, 128)

    def fits(tm_, tn_, tk_):
        return _block_bytes(tm_, tn_, tk_, in_bytes, out_bytes) + slack <= budget

    if tk is None:
        if fits(tm, tn, K):
            tk = K                       # single K pass -> no accumulator RMW
        else:
            cap = _TK_MAX
            while cap > 128 and not fits(tm, tn, cap):
                cap //= 2
            tk = _balanced_tile(_round_up(K, 128), cap, 128)
    tk = _sanitize_tile(tk, K, 128)

    # Robustness: shrink tn, then tm, if the chosen config still does not fit.
    while not fits(tm, tn, tk) and tn > 128:
        tn = _sanitize_tile(max(128, _round_up(tn // 2, 128)), N, 128)
    while not fits(tm, tn, tk) and tm > 8:
        tm = _sanitize_tile(max(8, _round_up(tm // 2, 8)), M, 8)

    # Keep both TensorCores busy on multi-core chips: ensure >= 2 parallel tiles.
    gm, gn = _cdiv(M, tm), _cdiv(N, tn)
    if auto_mn and gm * gn == 1:
        if N > 128 and tn > 128:
            tn = _sanitize_tile(max(128, _round_up(_cdiv(tn, 2), 128)), N, 128)
        elif M > 8 and tm > 8:
            tm = _sanitize_tile(max(8, _round_up(_cdiv(tm, 2), 8)), M, 8)
        gm, gn = _cdiv(M, tm), _cdiv(N, tn)

    kg = _cdiv(K, tk)
    Kp = kg * tk

    # ---- operands: optional bf16 cast; zero-pad along K only when split unevenly.
    xk = x.astype(in_dtype) if in_dtype != x.dtype else x
    Wk = W.astype(in_dtype) if in_dtype != W.dtype else W
    if Kp != K:
        # K padding is numerically exact (zeros add nothing to the contraction).
        # M/N raggedness is handled by partial boundary blocks -- no HBM pad copies.
        xk = jnp.pad(xk, ((0, 0), (0, Kp - K)))
        Wk = jnp.pad(Wk, ((0, 0), (0, Kp - K)))

    have_bias = bias is not None
    operands = [xk, Wk]
    if have_bias:
        operands.append(bias.reshape(1, N))

    if kg == 1:
        grid = (gm, gn)
        x_spec = pl.BlockSpec((tm, tk), lambda i, j: (i, 0))
        w_spec = pl.BlockSpec((tn, tk), lambda i, j: (j, 0))
        b_spec = pl.BlockSpec((1, tn), lambda i, j: (0, j))
        o_spec = pl.BlockSpec((tm, tn), lambda i, j: (i, j))
        dim_sem = ("parallel", "parallel")
        kernel = _mm_bias_single_kernel if have_bias else _mm_nobias_single_kernel
    else:
        grid = (gm, gn, kg)
        x_spec = pl.BlockSpec((tm, tk), lambda i, j, k: (i, k))
        w_spec = pl.BlockSpec((tn, tk), lambda i, j, k: (j, k))
        b_spec = pl.BlockSpec((1, tn), lambda i, j, k: (0, j))
        o_spec = pl.BlockSpec((tm, tn), lambda i, j, k: (i, j))
        dim_sem = ("parallel", "parallel", "arbitrary")
        kernel = _mm_bias_kernel if have_bias else _mm_nobias_kernel

    in_specs = [x_spec, w_spec] + ([b_spec] if have_bias else [])

    need = _block_bytes(tm, tn, tk, in_bytes, out_bytes)
    vmem_limit = min(max(32 << 20, need + (4 << 20)), int(capacity * 0.9))

    cost = pl.CostEstimate(
        flops=2 * M * N * K,
        transcendentals=0,
        bytes_accessed=M * K * in_bytes + N * K * in_bytes + M * N * out_bytes,
    )

    return pl.pallas_call(
        kernel,
        out_shape=jax.ShapeDtypeStruct((M, N), out_dtype),
        grid_spec=pltpu.PrefetchScalarGridSpec(
            num_scalar_prefetch=0,
            grid=grid,
            in_specs=in_specs,
            out_specs=o_spec,
        ),
        compiler_params=pltpu.CompilerParams(
            dimension_semantics=dim_sem,
            vmem_limit_bytes=vmem_limit,
        ),
        cost_estimate=cost,
    )(*operands)


def init_params(key, in_size, out_size, use_bias=True):
    """Deterministic init matching the module's __init__ semantics."""
    kw, kb = jax.random.split(key)
    # xavier_uniform_: U(-a, a), a = sqrt(6 / (fan_in + fan_out))
    a = (6.0 / (in_size + out_size)) ** 0.5
    W = jax.random.uniform(
        kw, (out_size, in_size), minval=-a, maxval=a, dtype=jnp.float32
    )
    b = jax.random.normal(kb, (out_size,), dtype=jnp.float32) if use_bias else None
    return W, b


if __name__ == "__main__":
    key = jax.random.PRNGKey(0)
    k1, k2, k3, k4 = jax.random.split(key, 4)

    # Case 1: aligned small shapes (batch=8, in=128, out=256), with bias.
    # Exercises the single-K fast path + the 2-tile parallel-grid split.
    batch, in_size, out_size = 8, 128, 256
    x = jax.random.normal(k1, (batch, in_size), dtype=jnp.float32)
    W, b = init_params(k2, in_size, out_size, use_bias=True)
    out = jax.block_until_ready(custom_linear(x, W, b))
    ref = x @ W.T + b
    assert out.shape == (batch, out_size)
    assert jnp.allclose(out, ref, atol=1e-4, rtol=1e-4), "bias case mismatch"

    # Case 2: ragged shapes (batch=5, in=96, out=200), no bias.
    # Exercises full-dim blocks + partial boundary output blocks (no HBM pads).
    batch2, in2, out2 = 5, 96, 200
    x2 = jax.random.normal(k3, (batch2, in2), dtype=jnp.float32)
    W2, _ = init_params(k2, in2, out2, use_bias=False)
    out_nb = jax.block_until_ready(custom_linear(x2, W2, None))
    ref_nb = x2 @ W2.T
    assert out_nb.shape == (batch2, out2)
    assert jnp.allclose(out_nb, ref_nb, atol=1e-4, rtol=1e-4), "no-bias case mismatch"

    # Case 3: forced multi-K path (tk override) to exercise the o_ref-accumulate
    # kernel at small shapes (batch=16, in=256, out=128), with bias.
    batch3, in3, out3 = 16, 256, 128
    x3 = jax.random.normal(k4, (batch3, in3), dtype=jnp.float32)
    W3, b3 = init_params(k2, in3, out3, use_bias=True)
    out_mk = jax.block_until_ready(custom_linear(x3, W3, b3, tk=128))
    ref_mk = x3 @ W3.T + b3
    assert out_mk.shape == (batch3, out3)
    assert jnp.allclose(out_mk, ref_mk, atol=1e-4, rtol=1e-4), "multi-K case mismatch"

    print("KERNEL_OK")
</pallas_src>

<mosaic_0001>
module attributes {stable_mosaic.version = 11 : i64} {
  func.func @_mm_bias_single_kernel(%arg0: i32, %arg1: i32, %arg2: memref<8x128xf32, #tpu.memory_space<vmem>>, %arg3: memref<128x128xf32, #tpu.memory_space<vmem>>, %arg4: memref<1x128xf32, #tpu.memory_space<vmem>>, %arg5: memref<8x128xf32, #tpu.memory_space<vmem>>) attributes {dimension_semantics = [#tpu.dimension_semantics<parallel>, #tpu.dimension_semantics<parallel>], iteration_bounds = array<i64: 1, 2>, scalar_prefetch = 0 : i64, scratch_operands = 0 : i64, tpu.core_type = #tpu.core_type<tc>, window_params = [{transform_indices = @transform_0, window_bounds = array<i64: 8, 128>}, {transform_indices = @transform_1, window_bounds = array<i64: 128, 128>}, {transform_indices = @transform_2, window_bounds = array<i64: 1, 128>}, {transform_indices = @transform_3, window_bounds = array<i64: 8, 128>}]} {
    %c0 = arith.constant 0 : index
    %c0_0 = arith.constant 0 : index
    %0 = vector.load %arg2[%c0, %c0_0] : memref<8x128xf32, #tpu.memory_space<vmem>>, vector<8x128xf32>
    %c0_1 = arith.constant 0 : index
    %c0_2 = arith.constant 0 : index
    %1 = vector.load %arg3[%c0_1, %c0_2] : memref<128x128xf32, #tpu.memory_space<vmem>>, vector<128x128xf32>
    %cst = arith.constant dense<0.000000e+00> : vector<8x128xf32>
    %2 = tpu.matmul %0, %1, %cst {dimension_numbers = #tpu.dot_dimension_numbers<[1], [1], [0], [0], [0, 0, 1, 0], [], []>} : vector<8x128xf32>, vector<128x128xf32>, vector<8x128xf32> -> vector<8x128xf32>
    %c0_3 = arith.constant 0 : index
    %c0_4 = arith.constant 0 : index
    %3 = vector.load %arg4[%c0_3, %c0_4] : memref<1x128xf32, #tpu.memory_space<vmem>>, vector<1x128xf32>
    %4 = vector.broadcast %3 : vector<1x128xf32> to vector<8x128xf32>
    %5 = arith.addf %2, %4 : vector<8x128xf32>
    %c0_5 = arith.constant 0 : index
    %c0_6 = arith.constant 0 : index
    %6 = vector.load %arg5[%c0_5, %c0_6] : memref<8x128xf32, #tpu.memory_space<vmem>>, vector<8x128xf32>
    tpu.vector_store %arg5[%c0_5, %c0_6], %5 {strides = array<i32>} : memref<8x128xf32, #tpu.memory_space<vmem>>, vector<8x128xf32>,
    return
  }
  func.func @transform_0(%arg0: i32, %arg1: i32) -> (i32, i32) {
    %c0_i32 = arith.constant 0 : i32
    %c0_i32_0 = arith.constant 0 : i32
    return %arg0, %c0_i32 : i32, i32
  }
  func.func @transform_1(%arg0: i32, %arg1: i32) -> (i32, i32) {
    %c0_i32 = arith.constant 0 : i32
    %c0_i32_0 = arith.constant 0 : i32
    return %arg1, %c0_i32 : i32, i32
  }
  func.func @transform_2(%arg0: i32, %arg1: i32) -> (i32, i32) {
    %c0_i32 = arith.constant 0 : i32
    %c0_i32_0 = arith.constant 0 : i32
    return %c0_i32, %arg1 : i32, i32
  }
  func.func @transform_3(%arg0: i32, %arg1: i32) -> (i32, i32) {
    %c0_i32 = arith.constant 0 : i32
    return %arg0, %arg1 : i32, i32
  }
}

</mosaic_0001>

<bundles_post_ra>
// kernel: custom_linear.1
= control target key start
LH: loop header
LB: loop body
LE: loop exit
PB: predicated region body
PF: predicated region fallthrough
CT: control target
= control target key end

     0   :  { %8 = vsyncpa [#allocation3], 0  ;;  %s1041_s0 = inlined_call_operand.hbm [shape: f32[8,128], index: 0, kind: input, shape index: {}]   ;;  %s1042_s1 = inlined_call_operand.hbm [shape: f32[256,128], index: 1, kind: input, shape index: {}]   ;;  %s1043_s2 = inlined_call_operand.vmem [shape: f32[1,256], index: 2, kind: input, shape index: {}]   ;;  %s1044_s3 = inlined_call_operand.hbm [shape: f32[8,256], index: 3, kind: output, shape index: {}]  }
   0x1   :  { %9 = vsyncpa [#allocation6], 0 }
   0x2   :  { %11 = vsyncpa [#allocation6 + $0x1], 0 }
   0x3   :  { %12 = vsyncpa [#allocation4], 0 }
   0x4   :  { %14 = vsyncpa [#allocation4 + $0x1], 0  ;;  %s798_s12 = smov 0   ;;  %s800_s13 = smov 0  }
   0x5   :  { %s802_s14 = smov 0   ;;  %s804_s15 = smov 0  }
   0x6   :  { %s806_s16 = smov 0   ;;  %s808_s17 = smov 0  }
   0x7 LB: > { %s452_s18 = sadd.s32 4294967295, %s768_s17   ;;  %s453_s19 = sadd.s32 4294967294, %s768_s17   ;;  %s768_s17 = sphi %s808_s17, %s20_s17   ;;  %s764_s16 = sphi %s806_s16, %s1072_s16   ;;  %s760_s15 = sphi %s804_s15, %s1071_s15   ;;  %s756_s14 = sphi %s802_s14, %s1070_s14   ;;  %s752_s13 = sphi %s800_s13, %s1069_s13   ;;  %s748_s12 = sphi %s798_s12, %s1068_s12  }
   0x8   : > { %s65_s20 = sadd.s32 1, %s756_s14  ;;  %p72_p0 = scmp.ne.s32.totalorder %s756_s14, %s752_s13 }
   0x9   : > { %p73_p1 = scmp.eq.s32.totalorder %s768_s17, 0  ;;  %p78_p2 = scmp.ne.s32.totalorder %s752_s13, %s748_s12 }
   0xa   : > { %p836_p3 = scmp.eq.s32.totalorder %s452_s18, 0  ;;  %p130_p4 = scmp.eq.s32.totalorder %s452_s18, 1 }
   0xb   : > { %p840_p5 = por %p73_p1, %p72_p0  ;;  %p136_p6 = scmp.eq.s32.totalorder %s453_s19, 1 }
   0xc   : > { %s1051_s21 = scalar_select %p836_p3, 1, 0 }
   0xd   : > { %p846_p7 = por %p836_p3, %p78_p2  ;;  %p850_p8 = por %p130_p4, %p72_p0 }
   0xe   : > { %p854_p9 = por %p136_p6, %p78_p2  ;;  %p454_p10 = scmp.ge.s32.totalorder %s768_s17, 1 }
   0xf   : > { %s1053_s23 = scalar_select %p846_p7, 1, 0 }
  0x10   : > { %s1054_s24 = scalar_select %p850_p8, 1, 0 }
  0x11   : > { %s1055_s25 = scalar_select %p854_p9, 1, 0 }
  0x12   : > { %p143_p11 = scmp.lt.s32.totalorder %s768_s17, 3  ;;  %s770_s27 = smov [#allocation2]  }
  0x13   : > { %s158_s28 = sshll.u32 %s770_s27, 4  ;;  %p567_p1 = scmp.lt.s32.totalorder %s768_s17, 2  ;;  %s159_s28 = int_to_ptr.vmem [resolvable:$true] %s158_s28 }
  0x14   : > { %p861_p13 = pnand %p454_p10, %p143_p11  ;;  %s29_s4 = sadd.s32 1, %s764_s16 }
  0x15   : > { %p870_p4 = pnand %p567_p1, %p840_p5  ;;  %p881_p6 = scmp.ge.s32.totalorder %s29_s4, 2 }
  0x16   : > { %s1056_s26 = scalar_select %p861_p13, 1, 0 }
  0x17   : > { %p554_p0 = pneg %p861_p13  ;;  %s169_s6 = sand.u32 1, %s756_s14  }
  0x18   : > { %s1057_s29 = scalar_select %p870_p4, 1, 0 }
  0x19   : > { %p876_p2 = pnand %p554_p0, %p836_p3  ;;  %s624_s9 = scalar_lea.hbm %s1041_s0, 128 }
  0x1a   : > { %s1059_s5 = scalar_select %p881_p6, 1, 0 }
  0x1b   : > { %p625_p5 = scmp.ne.s32.totalorder %s1041_s0, %s624_s9  ;;  %p626_p10 = pneg %p876_p2 }
  0x1c   : > { %p631_p0 = scmp.lt.u32.totalorder %s624_s9, %s1041_s0 }
  0x1d   : > { %p627_p11 = pnand %p626_p10, %p625_p5 }
  0x1f   : > { %p628_p1 = pneg %p627_p11 }
  0x21   : > { %p633_p12 = pnand %p631_p0, %p628_p1 }
  0x23   : > { %636 = shalt.err (!%p633_p12)
}
  0x24   : > { %s637_s22 = scalar_lea.vmem %s159_s28, 128  ;;  %p645_p3 = scmp.lt.s32.totalorder %s159_s28, %s159_s28 }
  0x25   : > { %p638_p9 = scmp.ne.s32.totalorder %s159_s28, %s637_s22  ;;  %p646_p13 = scmp.lt.s32.totalorder %s637_s22, %s637_s22 }
  0x27   : > { %p640_p8 = pnand %p638_p9, %p626_p10  ;;  %p647_p4 = por %p646_p13, %p645_p3 }
  0x29   : > { %p641_p7 = pneg %p640_p8 }
  0x2b   : > { %p648_p6 = pnand %p647_p4, %p641_p7 }
  0x2d   : > { %651 = shalt.err (!%p648_p6)
}
  0x2e   : > { %557 = dma.hbm_to_vmem [thread:$0]  (!%p876_p2), %s1041_s0, 128, %s159_s28, [#allocation3]  }
  0x2f   : > { %p1060_p9 = scmp.ne.s32.totalorder %s1059_s5, 0  ;;  %s457_s8 = sshll.u32 %s169_s6, 7 }
  0x30   : > { %s469_s10 = sshll.u32 %s764_s16, 11  ;;  %s173_s19 = scalar_lea.vmem [#allocation5], %s457_s8 }
  0x31   : > { %s1074_s4 = smov (%p1060_p9, %s29_s4), 0  ;;  %s912_s18 = scalar_lea.hbm %s1042_s1, %s469_s10 }
  0x32   : > { %s62_s9 = ssub.s32 %s764_s16, %s1074_s4  ;;  %s180_s22 = sshll.u32 %s173_s19, 4  ;;  %s919_s22 = int_to_ptr.vmem [resolvable:$true] %s180_s22 }
  0x33   : > { %p63_p3 = scmp.eq.s32.totalorder %s62_s9, 0  ;;  %s921_s5 = scalar_lea.sflag [#allocation6], %s169_s6 }
  0x34   : > { %s652_s27 = scalar_lea.hbm %s912_s18, 2048  ;;  %p1061_p8 = scmp.ne.s32.totalorder %s1057_s29, 0 }
  0x35   : > { %s917_s28 = scalar_select %p63_p3, %s756_s14, %s65_s20  }
  0x36   : > { %p653_p7 = scmp.ne.s32.totalorder %s912_s18, %s652_s27  ;;  %p654_p12 = pneg %p1061_p8 }
  0x37   : > { %s657_s8 = scalar_lea.hbm %s1042_s1, 4096  ;;  %p658_p2 = scmp.lt.u32.totalorder %s912_s18, %s1042_s1 }
  0x38   : > { %p655_p13 = pnand %p654_p12, %p653_p7  ;;  %p659_p6 = scmp.lt.u32.totalorder %s657_s8, %s652_s27 }
  0x39   : > { %p661_p10 = scmp.lt.u32.totalorder %s652_s27, %s912_s18 }
  0x3a   : > { %p656_p4 = pneg %p655_p13  ;;  %p660_p5 = por %p659_p6, %p658_p2 }
  0x3c   : > { %p662_p11 = por %p661_p10, %p660_p5 }
  0x3e   : > { %p663_p1 = pnand %p662_p11, %p656_p4 }
  0x40   : > { %666 = shalt.err (!%p663_p1)
}
  0x41   : > { %s667_s20 = scalar_lea.vmem %s919_s22, 2048  ;;  %s771_s6 = smov [#allocation5]  }
  0x42   : > { %p668_p0 = scmp.ne.s32.totalorder %s919_s22, %s667_s20  ;;  %s672_s11 = sshll.u32 %s771_s6, 4  ;;  %s673_s11 = int_to_ptr.vmem [resolvable:$false] %s672_s11 }
  0x43   : > { %s674_s19 = scalar_lea.vmem %s673_s11, 4096  ;;  %p675_p7 = scmp.lt.s32.totalorder %s919_s22, %s673_s11 }
  0x44   : > { %p670_p9 = pnand %p668_p0, %p654_p12  ;;  %p676_p13 = scmp.lt.s32.totalorder %s674_s19, %s667_s20 }
  0x46   : > { %p671_p3 = pneg %p670_p9  ;;  %p677_p2 = por %p676_p13, %p675_p7 }
  0x48   : > { %p678_p6 = pnand %p677_p2, %p671_p3 }
  0x4a   : > { %681 = shalt.err (!%p678_p6)
}
  0x4b   : > { %s772_s27 = smov 128   ;;  %s773_s7 = smov 8  }
  0x4c   : > { %561 = dma.hbm_to_vmem [thread:$0]  (!%p1061_p8), %s912_s18, 2048, %s919_s22, %s921_s5, %s772_s27, %s772_s27, %s773_s7  }
  0x4d   : > { %p1062_p12 = scmp.ne.s32.totalorder %s1056_s26, 0 }
  0x4e   : > { %p1063_p4 = scmp.ne.s32.totalorder (!%p1062_p12), %s1051_s21, 0 }
  0x4f   : > { %198 = sbr.rel (%p1062_p12) target bundleno = 385 (0x181), region = 32 }
  0x56   : > { %735 = dma.done.wait (%p1063_p4), [#allocation3], 128  }
  0x57   : > { %737 = vsyncadd (%p1063_p4), [#allocation3], 4294967168  ;;  %s956_s9 = sand.u32 1, %s752_s13   ;;  %p1064_p8 = scmp.ne.s32.totalorder %s1053_s23, 0 }
  0x58   : > { %s462_s8 = sshll.u32 %s956_s9, 7  ;;  %s205_s10 = scalar_lea.sflag [#allocation6], %s956_s9 }
  0x59   : > { %s960_s30 = scalar_lea.vmem [#allocation5], %s462_s8 }
  0x5a   : > { %739 = dma.done.wait (%p1064_p8), %s205_s10, 2048  }
  0x5b   : > { %741 = vsyncadd (%p1064_p8), %s205_s10, 4294965248  ;;  %v774_v0 = vmov 0.0|0.0   ;;  %vm775_vm0 = vmmov 0   ;;  %v776_v1 = vmov 0.0   ;;  %v239_v2 = vld [vmem:[%s960_s30] sm:$0xff]  ;;  %v240_v3 = vld [vmem:[%s960_s30 + $0x8] sm:$0xff] }
  0x5c   : > { %522 = vmatprep.subr.bf16.mxu0 %v774_v0  ;;  %519 = vmatprep.mubr.msk.f32.mxu0 %vm775_vm0, %v776_v1  ;;  %v523_v4 = vpack.c.bf16 %v240_v3, %v239_v2  ;;  %v241_v5 = vld [vmem:[%s960_s30 + $0x10] sm:$0xff]  ;;  %v242_v6 = vld [vmem:[%s960_s30 + $0x18] sm:$0xff]  ;;  %v243_v8 = vld [vmem:[%s960_s30 + $0x20] sm:$0xff]  ;;  %p235_p5 = scmp.lt.s32.totalorder %s760_s15, 1  ;;  %s463_s23 = sshll.u32 %s956_s9, 3 }
  0x5d   : > { %v526_v7 = vpack.c.bf16 %v242_v6, %v241_v5  ;;  %v244_v9 = vld [vmem:[%s960_s30 + $0x28] sm:$0xff]  ;;  %v245_v11 = vld [vmem:[%s960_s30 + $0x30] sm:$0xff]  ;;  %v246_v12 = vld [vmem:[%s960_s30 + $0x38] sm:$0xff]  ;;  %s466_s22 = sshll.u32 %s760_s15, 7  ;;  %s233_s5 = scalar_lea.vmem [#allocation7], %s463_s23 }
  0x5e   : > { %524 = vmatpush3.bf16.xpose.msra.mxu0 %v523_v4  ;;  %v529_v10 = vpack.c.bf16 %v244_v9, %v243_v8  ;;  %v532_v13 = vpack.c.bf16 %v246_v12, %v245_v11  ;;  %v247_v14 = vld [vmem:[%s960_s30 + $0x40] sm:$0xff]  ;;  %v248_v15 = vld [vmem:[%s960_s30 + $0x48] sm:$0xff]  ;;  %v249_v17 = vld [vmem:[%s960_s30 + $0x50] sm:$0xff]  ;;  %s236_s21 = scalar_select %p235_p5, %s760_s15, 1 }
  0x5f   : > { %525 = vmatprep.subr.bf16.mxu0 %v774_v0  ;;  %v535_v16 = vpack.c.bf16 %v248_v15, %v247_v14  ;;  %v250_v18 = vld [vmem:[%s960_s30 + $0x58] sm:$0xff]  ;;  %v251_v20 = vld [vmem:[%s960_s30 + $0x60] sm:$0xff]  ;;  %v252_v21 = vld [vmem:[%s960_s30 + $0x68] sm:$0xff]  ;;  %s349_s20 = sshll.u32 %s233_s5, 4  ;;  %s992_s19 = scalar_lea.hbm %s1044_s3, %s466_s22  ;;  %s994_s20 = int_to_ptr.vmem [resolvable:$true] %s349_s20 }
  0x60   : > { %v538_v19 = vpack.c.bf16 %v250_v18, %v249_v17  ;;  %v541_v22 = vpack.c.bf16 %v252_v21, %v251_v20  ;;  %v253_v23 = vld [vmem:[%s960_s30 + $0x70] sm:$0xff]  ;;  %v254_v24 = vld [vmem:[%s960_s30 + $0x78] sm:$0xff]  ;;  %s237_s18 = scalar_lea.vmem %s1043_s2, %s236_s21  ;;  %s334_s27 = scalar_lea.sflag [#allocation4], %s956_s9 }
  0x61   : > { %v544_v25 = vpack.c.bf16 %v254_v24, %v253_v23  ;;  %v238_v26 = vld [vmem:[#allocation2] sm:$0xff]  ;;  %s682_s7 = scalar_lea.vmem %s994_s20, 128  ;;  %p1065_p11 = scmp.ne.s32.totalorder %s1054_s24, 0 }
  0x62   : > { %v464_v27 = vld [vmem:[%s237_s18] ss:$0 sm:$0xff]  ;;  %p683_p10 = scmp.ne.s32.totalorder %s994_s20, %s682_s7  ;;  %s777_s15 = smov [#allocation7]  }
  0x63   : > { %s686_s8 = sshll.u32 %s777_s15, 4  ;;  %s687_s8 = int_to_ptr.vmem [resolvable:$false] %s686_s8 }
  0x64   : > { %p684_p1 = pnand %p683_p10, %p1065_p11  ;;  %s688_s10 = scalar_lea.vmem %s687_s8, 256 }
  0x65   : > { %p689_p9 = scmp.lt.s32.totalorder %s994_s20, %s687_s8  ;;  %p690_p3 = scmp.lt.s32.totalorder %s688_s10, %s682_s7 }
  0x66   : > { %527 = vmatpush3.bf16.xpose.msra.mxu0 %v526_v7  ;;  %p685_p0 = pneg %p684_p1 }
  0x67   : > { %528 = vmatprep.subr.bf16.mxu0 %v774_v0  ;;  %p691_p7 = por %p690_p3, %p689_p9 }
  0x69   : > { %p692_p13 = pnand %p691_p7, %p685_p0 }
  0x6e   : > { %530 = vmatpush3.bf16.xpose.msra.mxu0 %v529_v10 }
  0x6f   : > { %531 = vmatprep.subr.bf16.mxu0 %v774_v0 }
  0x76   : > { %533 = vmatpush3.bf16.xpose.msra.mxu0 %v532_v13 }
  0x77   : > { %534 = vmatprep.subr.bf16.mxu0 %v774_v0 }
  0x7e   : > { %536 = vmatpush3.bf16.xpose.msra.mxu0 %v535_v16 }
  0x7f   : > { %537 = vmatprep.subr.bf16.mxu0 %v774_v0 }
  0x86   : > { %539 = vmatpush3.bf16.xpose.msra.mxu0 %v538_v19 }
  0x87   : > { %540 = vmatprep.subr.bf16.mxu0 %v774_v0 }
  0x8e   : > { %542 = vmatpush3.bf16.xpose.msra.mxu0 %v541_v22 }
  0x8f   : > { %543 = vmatprep.subr.bf16.mxu0 %v774_v0 }
  0x96   : > { %545 = vmatpush3.bf16.xpose.msra.mxu0 %v544_v25 }
  0x9d   : > { %520 = vmatmul.mubr.f32.vlgmr.msra.gmra.mrb[0].mxu0 %v238_v26 }
 0x170   : > { %v328_v28 = vpop.f32.mrb[0].mxu0 }
 0x171   : > { %v329_v29 = vadd.f32 %v464_v27, %v328_v28  ;;  %v521_v30 = vpop.f32.mrb[1].mxu0 }
 0x173   : > { %332 = vst [vmem:[%s233_s5] sm:$0xff] %v329_v29 }
 0x174   : > { %695 = shalt.err (!%p692_p13)
}
 0x175   : > { %s696_s9 = scalar_lea.hbm %s992_s19, 128  ;;  %s700_s23 = scalar_lea.hbm %s1044_s3, 256 }
 0x176   : > { %p697_p2 = scmp.ne.s32.totalorder %s992_s19, %s696_s9  ;;  %p701_p4 = scmp.lt.u32.totalorder %s992_s19, %s1044_s3 }
 0x177   : > { %p702_p8 = scmp.lt.u32.totalorder %s700_s23, %s696_s9  ;;  %p704_p10 = scmp.lt.u32.totalorder %s696_s9, %s992_s19 }
 0x178   : > { %p698_p6 = pnand %p697_p2, %p1065_p11 }
 0x179   : > { %p703_p5 = por %p702_p8, %p701_p4 }
 0x17a   : > { %p699_p12 = pneg %p698_p6 }
 0x17b   : > { %p705_p1 = por %p704_p10, %p703_p5 }
 0x17d   : > { %p706_p0 = pnand %p705_p1, %p699_p12 }
 0x17f   : > { %709 = shalt.err (!%p706_p0)
}
 0x180   : > { %552 = dma.vmem_to_hbm [thread:$0]  (%p1065_p11), %s994_s20, 128, %s992_s19, %s334_s27  }
 0x181 PF: > { %s361_s18 = sand.u32 1, %s748_s12   ;;  %p1066_p9 = scmp.ne.s32.totalorder %s1055_s25, 0 }
 0x182   : > { %p1067_p3 = scmp.ge.s32.totalorder %s768_s17, 2  ;;  %s362_s22 = scalar_lea.sflag [#allocation4], %s361_s18 }
 0x184   : > { %p563_p7 = pnand %p1067_p3, %p1066_p9 }
 0x186   : > { %743 = dma.done.wait (!%p563_p7), %s362_s22, 128  }
 0x187   : > { %745 = vsyncadd (!%p563_p7), %s362_s22, 4294967168  ;;  %s20_s17 = sadd.s32 1, %s768_s17   ;;  %s1068_s12 = smov %s752_s13 }
 0x188   : > { %p17_p13 = scmp.ge.s32.totalorder %s20_s17, 4   ;;  %s1069_s13 = smov %s756_s14 }
 0x189   : > { %s1070_s14 = smov %s917_s28  ;;  %s1071_s15 = smov %s764_s16 }
 0x18a   : > { %s1072_s16 = smov %s1074_s4  ;;  %19 = sbr.rel (!%p17_p13) target bundleno = 7 (0x7), region = 86 }
 0x191   :  { %367 = vsyncpa [#allocation3], 1 }
 0x192   :  { %369 = vsyncpa [#allocation3 + $0x1], 1 }
 0x193   :  { %370 = vsyncpa [#allocation6], 1 }
 0x194   :  { %372 = vsyncpa [#allocation6 + $0x1], 1 }
 0x195   :  { %373 = vsyncpa [#allocation4], 1 }
 0x196   :  { %375 = vsyncpa [#allocation4 + $0x1], 1 }

</bundles_post_ra>
